<compile_context>
chip_gen: v7x
topology: tpu7x:2x2x1
jax: 0.10.0
libtpu: 0.0.40
codegen_flags: <defaults>
</compile_context>

<pallas_src>
import functools

import jax
import jax.numpy as jnp
import numpy as np
from jax.experimental import pallas as pl
from jax.experimental.pallas import tpu as pltpu

EPS = 1e-5


# ---------------------------------------------------------------------------
# wrapper-side weight preprocessing (pure gather + 0/1 mask -> exact, tiny,
# parameter-only; in a real model this is done once per weight update)
# ---------------------------------------------------------------------------
def _band_conv3x3(w_hwio, W):
    """(3, 3, Cin, Cout) HWIO weights -> (3, W*Cin, W*Cout) banded matrices.

    BigW[kh, wi*Cin + c, wo*Cout + o] = w[kh, wi-wo+1, c, o] if |wi-wo| <= 1
    else 0, so that  conv3x3(x)[h] == sum_kh  Xp[h+kh, :] @ BigW[kh]
    where Xp is the row-padded lane-dense (H+2, W*Cin) image.  The zero
    padding along W is folded into the band as zero coefficients.
    """
    KH, KW, Cin, Cout = w_hwio.shape
    a = np.arange(W)[:, None]                    # wi (input column)
    b = np.arange(W)[None, :]                    # wo (output column)
    k = a - b + 1                                # kw tap index
    valid = jnp.asarray(((k >= 0) & (k < KW)).astype(np.float32))
    kc = np.clip(k, 0, KW - 1)
    g = w_hwio[:, kc, :, :]                      # (KH, W, W, Cin, Cout)
    g = g * valid[None, :, :, None, None]
    g = jnp.transpose(g, (0, 1, 3, 2, 4))        # (KH, wi, Cin, wo, Cout)
    return g.reshape(KH, W * Cin, W * Cout)


def _band_conv1x1(ws, W):
    """(Cin, Cout) 1x1-conv weights -> block-diagonal (W*Cin, W*Cout)."""
    Cin, Cout = ws.shape
    eye = jnp.asarray(np.eye(W, dtype=np.float32))
    g = eye[:, None, :, None] * ws[None, :, None, :]   # (W, Cin, W, Cout)
    return g.reshape(W * Cin, W * Cout)


def _tile_wc(v, W):
    """Per-channel (1, C) or (C,) vector -> lane-dense (1, W*C), channel fastest."""
    return jnp.tile(v.reshape(-1), (W,)).reshape(1, -1)


def _bn_scale_shift(y_packed, gamma, beta, N, H, W, C):
    """Finalize global-batch BN from packed per-image partial sums.

    y_packed: (N, H+2, W*C); row H = sum over rows, row H+1 = sum of squares.
    Returns lane-dense (1, W*C) scale/shift such that bn(y) = y*scale + shift.
    """
    count = float(N * H * W)
    s = jnp.sum(y_packed[:, H, :].reshape(N, W, C), axis=(0, 1))
    sq = jnp.sum(y_packed[:, H + 1, :].reshape(N, W, C), axis=(0, 1))
    mean = s / count
    # TODO(synk): E[x^2]-E[x]^2 is cancellation-prone if activation magnitudes
    # grow; switch to centered/Welford partial sums in that regime.
    var = sq / count - mean * mean
    scale = gamma.reshape(-1) * jax.lax.rsqrt(var + EPS)
    shift = beta.reshape(-1) - mean * scale
    return _tile_wc(scale, W), _tile_wc(shift, W)


# ---------------------------------------------------------------------------
# in-kernel helpers
# ---------------------------------------------------------------------------
def _conv3x3_banded(x_rows, bw_ref, b_ref, xp_ref, H):
    """3x3 / stride-1 / pad-1 conv of one image as 3 lane-dense MXU dots.

    x_rows: (H, W*Cin) value (lane-dense, channel fastest within a row)
    bw_ref: (3, W*Cin, W*Cout) banded weight ref
    b_ref:  (1, W*Cout) pre-tiled bias ref
    xp_ref: (H+2, W*Cin) VMEM scratch (row halo only; W halo is in the band)
    returns (H, W*Cout) float32
    """
    WCin = x_rows.shape[1]
    zrow = jnp.zeros((1, WCin), jnp.float32)
    # Dense halo handling: two full-lane-width row stores + one dense interior
    # store (re-done every grid step -> correct under megacore sharding).
    xp_ref[0:1, :] = zrow
    xp_ref[H + 1:H + 2, :] = zrow
    xp_ref[1:H + 1, :] = x_rows
    acc = jnp.dot(xp_ref[0:H, :], bw_ref[0], preferred_element_type=jnp.float32)
    acc = acc + jnp.dot(xp_ref[1:H + 1, :], bw_ref[1], preferred_element_type=jnp.float32)
    acc = acc + jnp.dot(xp_ref[2:H + 2, :], bw_ref[2], preferred_element_type=jnp.float32)
    return acc + b_ref[...]


def _store_with_stats(o_ref, y, H):
    """Write y plus packed BN partial stats (sum, sum^2 over rows) as 2 extra rows."""
    o_ref[0, 0:H, :] = y
    o_ref[0, H:H + 1, :] = jnp.sum(y, axis=0, keepdims=True)
    o_ref[0, H + 1:H + 2, :] = jnp.sum(y * y, axis=0, keepdims=True)


# ---------------------------------------------------------------------------
# pass A: conv1 (+ 1x1 projection shortcut), BN partial stats packed in-tile
# ---------------------------------------------------------------------------
def make_kernel_a(H, use_proj):
    def kernel(*refs):
        if use_proj:
            x_ref, bw1_ref, b1_ref, bws_ref, bs_ref, y1_ref, ys_ref, xp_ref = refs
        else:
            x_ref, bw1_ref, b1_ref, y1_ref, xp_ref = refs

        x = x_ref[0]                                         # (H, W*Cin)
        y1 = _conv3x3_banded(x, bw1_ref, b1_ref, xp_ref, H)  # (H, W*Cout)
        _store_with_stats(y1_ref, y1, H)

        if use_proj:
            ys = jnp.dot(x, bws_ref[...],
                         preferred_element_type=jnp.float32) + bs_ref[...]
            _store_with_stats(ys_ref, ys, H)
    return kernel


# ---------------------------------------------------------------------------
# pass B: bn1 (global scale/shift) + ReLU + conv2, stats packed in-tile
# ---------------------------------------------------------------------------
def make_kernel_b(H):
    def kernel(y1_ref, sc1_ref, sh1_ref, bw2_ref, b2_ref, y2_ref, xp_ref):
        h = jnp.maximum(y1_ref[0, 0:H, :] * sc1_ref[...] + sh1_ref[...], 0.0)
        y2 = _conv3x3_banded(h, bw2_ref, b2_ref, xp_ref, H)
        _store_with_stats(y2_ref, y2, H)
    return kernel


# ---------------------------------------------------------------------------
# wrapper
# ---------------------------------------------------------------------------
def init_block_params(key, in_channels, out_channels):
    """Deterministic synthetic parameters (HWIO conv weights, float32)."""
    ks = jax.random.split(key, 3)
    scale1 = 1.0 / np.sqrt(9 * in_channels)
    scale2 = 1.0 / np.sqrt(9 * out_channels)
    scales = 1.0 / np.sqrt(in_channels)
    p = {
        "w1": scale1 * jax.random.normal(ks[0], (3, 3, in_channels, out_channels), jnp.float32),
        "b1": 0.01 * jnp.ones((1, out_channels), jnp.float32),
        "g1": jnp.ones((1, out_channels), jnp.float32),
        "be1": jnp.zeros((1, out_channels), jnp.float32),
        "w2": scale2 * jax.random.normal(ks[1], (3, 3, out_channels, out_channels), jnp.float32),
        "b2": -0.01 * jnp.ones((1, out_channels), jnp.float32),
        "g2": jnp.ones((1, out_channels), jnp.float32),
        "be2": jnp.zeros((1, out_channels), jnp.float32),
    }
    if in_channels != out_channels:
        p.update({
            "ws": scales * jax.random.normal(ks[2], (in_channels, out_channels), jnp.float32),
            "bs": 0.02 * jnp.ones((1, out_channels), jnp.float32),
            "gs": jnp.ones((1, out_channels), jnp.float32),
            "bes": jnp.zeros((1, out_channels), jnp.float32),
        })
    return p


@functools.partial(jax.jit, static_argnames=("stride",))
def block_forward(x_nchw, params, stride=1):
    """Pallas implementation of Block.forward. Input/output are NCHW (PyTorch)."""
    if stride != 1:
        raise NotImplementedError("stride=2 not implemented")  # TODO(synk)
    N, Cin, H, W = x_nchw.shape
    Cout = params["w1"].shape[-1]
    use_proj = "ws" in params
    f32 = jnp.float32
    WCin, WCout = W * Cin, W * Cout

    # NCHW -> folded lane-dense NHWC (N, H, W*Cin).
    # TODO(synk): drop this boundary transpose if the surrounding model is NHWC.
    x2 = jnp.transpose(x_nchw, (0, 2, 3, 1)).astype(f32).reshape(N, H, WCin)

    # Banded / pre-tiled parameters (lane-dense layouts for the kernels).
    bw1 = _band_conv3x3(params["w1"].astype(f32), W)     # (3, WCin, WCout)
    bw2 = _band_conv3x3(params["w2"].astype(f32), W)     # (3, WCout, WCout)
    b1t = _tile_wc(params["b1"], W)                       # (1, WCout)
    b2t = _tile_wc(params["b2"], W)

    cparams = pltpu.CompilerParams(
        dimension_semantics=("parallel",),     # megacore split on v7x
        vmem_limit_bytes=32 * 1024 * 1024,     # safe across v5e/v6e/v7x; raise
                                               # toward 64-96 MiB on v5e/v6e
                                               # once real-shape tiles land
    )

    # ----- pass A: conv1 (+ projection shortcut); stats packed as rows H, H+1
    a_in_specs = [
        pl.BlockSpec((1, H, WCin), lambda i: (i, 0, 0)),          # x (folded)
        pl.BlockSpec((3, WCin, WCout), lambda i: (0, 0, 0)),      # banded w1
        pl.BlockSpec((1, WCout), lambda i: (0, 0)),               # bias1 tiled
    ]
    a_out_shape = [jax.ShapeDtypeStruct((N, H + 2, WCout), f32)]  # y1 + stats
    a_out_specs = [pl.BlockSpec((1, H + 2, WCout), lambda i: (i, 0, 0))]
    a_args = [x2, bw1, b1t]
    if use_proj:
        bws = _band_conv1x1(params["ws"].astype(f32), W)          # (WCin, WCout)
        bst = _tile_wc(params["bs"], W)
        a_in_specs += [pl.BlockSpec((WCin, WCout), lambda i: (0, 0)),
                       pl.BlockSpec((1, WCout), lambda i: (0, 0))]
        a_out_shape += [jax.ShapeDtypeStruct((N, H + 2, WCout), f32)]  # ys + stats
        a_out_specs += [pl.BlockSpec((1, H + 2, WCout), lambda i: (i, 0, 0))]
        a_args += [bws, bst]

    a_out = pl.pallas_call(
        make_kernel_a(H, use_proj),
        grid=(N,),
        in_specs=a_in_specs,
        out_shape=a_out_shape,
        out_specs=a_out_specs,
        scratch_shapes=[pltpu.VMEM((H + 2, WCin), f32)],
        compiler_params=cparams,
    )(*a_args)
    if use_proj:
        y1p, ysp = a_out
    else:
        (y1p,) = a_out

    sc1, sh1 = _bn_scale_shift(y1p, params["g1"], params["be1"], N, H, W, Cout)

    # ----- pass B: bn1 + ReLU + conv2; stats packed as rows H, H+1 -----
    y2p = pl.pallas_call(
        make_kernel_b(H),
        grid=(N,),
        in_specs=[pl.BlockSpec((1, H + 2, WCout), lambda i: (i, 0, 0)),   # y1 + stats
                  pl.BlockSpec((1, WCout), lambda i: (0, 0)),             # bn1 scale
                  pl.BlockSpec((1, WCout), lambda i: (0, 0)),             # bn1 shift
                  pl.BlockSpec((3, WCout, WCout), lambda i: (0, 0, 0)),   # banded w2
                  pl.BlockSpec((1, WCout), lambda i: (0, 0))],            # bias2 tiled
        out_shape=jax.ShapeDtypeStruct((N, H + 2, WCout), f32),
        out_specs=pl.BlockSpec((1, H + 2, WCout), lambda i: (i, 0, 0)),
        scratch_shapes=[pltpu.VMEM((H + 2, WCout), f32)],
        compiler_params=cparams,
    )(y1p, sc1, sh1, bw2, b2t)

    sc2, sh2 = _bn_scale_shift(y2p, params["g2"], params["be2"], N, H, W, Cout)

    # ----- epilogue (XLA): bn2+ReLU, shortcut bn+ReLU, residual add -----
    # Pure elementwise FMA+ReLU+add on lane-dense (N, H, W*Cout); left to XLA
    # per perf review (a third pallas_call's launch/DMA cost rivals its compute
    # and XLA fuses this with the output transpose).
    main = jnp.maximum(y2p[:, :H, :] * sc2 + sh2, 0.0)
    if use_proj:
        scs, shs = _bn_scale_shift(ysp, params["gs"], params["bes"], N, H, W, Cout)
        shortcut = jnp.maximum(ysp[:, :H, :] * scs + shs, 0.0)
    else:
        shortcut = x2                                   # identity (Cin == Cout)
    out = (main + shortcut).reshape(N, H, W, Cout)
    return jnp.transpose(out, (0, 3, 1, 2))             # back to NCHW


# ---------------------------------------------------------------------------
# pure-JAX reference (training-mode BN) for correctness checking
# ---------------------------------------------------------------------------
def block_forward_ref(x_nchw, params):
    x = jnp.transpose(x_nchw, (0, 2, 3, 1)).astype(jnp.float32)
    hp = jax.lax.Precision.HIGHEST

    def conv(x, w, b, pad):
        y = jax.lax.conv_general_dilated(
            x, w, (1, 1), pad, dimension_numbers=("NHWC", "HWIO", "NHWC"),
            precision=hp)
        return y + b

    def bn_relu(y, g, b):
        m = jnp.mean(y, axis=(0, 1, 2), keepdims=True)
        v = jnp.mean((y - m) ** 2, axis=(0, 1, 2), keepdims=True)
        return jax.nn.relu((y - m) * jax.lax.rsqrt(v + EPS) * g + b)

    h = bn_relu(conv(x, params["w1"], params["b1"], "SAME"), params["g1"], params["be1"])
    h = bn_relu(conv(h, params["w2"], params["b2"], "SAME"), params["g2"], params["be2"])
    if "ws" in params:
        sc = bn_relu(conv(x, params["ws"][None, None], params["bs"], "VALID"),
                     params["gs"], params["bes"])
    else:
        sc = x
    return jnp.transpose(h + sc, (0, 3, 1, 2))


if __name__ == "__main__":
    key = jax.random.PRNGKey(0)
    kx, kp = jax.random.split(key)

    N, Cin, Cout, H, W = 2, 4, 8, 16, 16   # Cin != Cout -> projection shortcut
    x = jax.random.normal(kx, (N, Cin, H, W), jnp.float32)
    params = init_block_params(kp, Cin, Cout)

    out = block_forward(x, params, stride=1)
    out = jax.block_until_ready(out)
    assert out.shape == (N, Cout, H, W)

    ref = block_forward_ref(x, params)
    np.testing.assert_allclose(np.asarray(out), np.asarray(ref), rtol=1e-3, atol=1e-3)

    print("KERNEL_OK")
</pallas_src>

<mosaic_0001>
module attributes {stable_mosaic.version = 11 : i64} {
  func.func @kernel(%arg0: i32, %arg1: memref<1x16x64xf32, #tpu.memory_space<vmem>>, %arg2: memref<3x64x128xf32, #tpu.memory_space<vmem>>, %arg3: memref<1x128xf32, #tpu.memory_space<vmem>>, %arg4: memref<64x128xf32, #tpu.memory_space<vmem>>, %arg5: memref<1x128xf32, #tpu.memory_space<vmem>>, %arg6: memref<1x18x128xf32, #tpu.memory_space<vmem>>, %arg7: memref<1x18x128xf32, #tpu.memory_space<vmem>>, %arg8: memref<18x64xf32, #tpu.memory_space<vmem>>) attributes {dimension_semantics = [#tpu.dimension_semantics<parallel>], iteration_bounds = array<i64: 2>, scalar_prefetch = 0 : i64, scratch_operands = 1 : i64, tpu.core_type = #tpu.core_type<tc>, window_params = [{transform_indices = @transform_0, window_bounds = array<i64: 1, 16, 64>}, {pipeline_mode = #tpu.pipeline_mode<synchronous>, transform_indices = @transform_1, window_bounds = array<i64: 3, 64, 128>}, {pipeline_mode = #tpu.pipeline_mode<synchronous>, transform_indices = @transform_2, window_bounds = array<i64: 1, 128>}, {pipeline_mode = #tpu.pipeline_mode<synchronous>, transform_indices = @transform_3, window_bounds = array<i64: 64, 128>}, {pipeline_mode = #tpu.pipeline_mode<synchronous>, transform_indices = @transform_4, window_bounds = array<i64: 1, 128>}, {transform_indices = @transform_5, window_bounds = array<i64: 1, 18, 128>}, {transform_indices = @transform_6, window_bounds = array<i64: 1, 18, 128>}]} {
    %c0 = arith.constant 0 : index
    %c0_0 = arith.constant 0 : index
    %c0_1 = arith.constant 0 : index
    %0 = vector.load %arg1[%c0, %c0_0, %c0_1] : memref<1x16x64xf32, #tpu.memory_space<vmem>>, vector<1x16x64xf32>
    %1 = vector.shape_cast %0 : vector<1x16x64xf32> to vector<16x64xf32>
    %cst = arith.constant 0.000000e+00 : f32
    %2 = vector.broadcast %cst : f32 to vector<1x64xf32>
    %c0_2 = arith.constant 0 : index
    %c0_3 = arith.constant 0 : index
    %3 = vector.load %arg8[%c0_2, %c0_3] : memref<18x64xf32, #tpu.memory_space<vmem>>, vector<1x64xf32>
    tpu.vector_store %arg8[%c0_2, %c0_3], %2 {strides = array<i32>} : memref<18x64xf32, #tpu.memory_space<vmem>>, vector<1x64xf32>,
    %c17 = arith.constant 17 : index
    %c0_4 = arith.constant 0 : index
    %4 = vector.load %arg8[%c17, %c0_4] : memref<18x64xf32, #tpu.memory_space<vmem>>, vector<1x64xf32>
    tpu.vector_store %arg8[%c17, %c0_4], %2 {strides = array<i32>} : memref<18x64xf32, #tpu.memory_space<vmem>>, vector<1x64xf32>,
    %c1 = arith.constant 1 : index
    %c0_5 = arith.constant 0 : index
    %5 = vector.load %arg8[%c1, %c0_5] : memref<18x64xf32, #tpu.memory_space<vmem>>, vector<16x64xf32>
    tpu.vector_store %arg8[%c1, %c0_5], %1 {strides = array<i32>} : memref<18x64xf32, #tpu.memory_space<vmem>>, vector<16x64xf32>,
    %c0_6 = arith.constant 0 : index
    %c0_7 = arith.constant 0 : index
    %6 = vector.load %arg8[%c0_6, %c0_7] : memref<18x64xf32, #tpu.memory_space<vmem>>, vector<16x64xf32>
    %c0_8 = arith.constant 0 : index
    %c0_9 = arith.constant 0 : index
    %c0_10 = arith.constant 0 : index
    %7 = vector.load %arg2[%c0_8, %c0_9, %c0_10] : memref<3x64x128xf32, #tpu.memory_space<vmem>>, vector<1x64x128xf32>
    %8 = vector.shape_cast %7 : vector<1x64x128xf32> to vector<64x128xf32>
    %cst_11 = arith.constant dense<0.000000e+00> : vector<16x128xf32>
    %9 = tpu.matmul %6, %8, %cst_11 {dimension_numbers = #tpu.dot_dimension_numbers<[1], [0], [0], [1], [0, 0, 1, 1], [], []>} : vector<16x64xf32>, vector<64x128xf32>, vector<16x128xf32> -> vector<16x128xf32>
    %c1_12 = arith.constant 1 : index
    %c0_13 = arith.constant 0 : index
    %10 = vector.load %arg8[%c1_12, %c0_13] : memref<18x64xf32, #tpu.memory_space<vmem>>, vector<16x64xf32>
    %c1_14 = arith.constant 1 : index
    %c0_15 = arith.constant 0 : index
    %c0_16 = arith.constant 0 : index
    %11 = vector.load %arg2[%c1_14, %c0_15, %c0_16] : memref<3x64x128xf32, #tpu.memory_space<vmem>>, vector<1x64x128xf32>
    %12 = vector.shape_cast %11 : vector<1x64x128xf32> to vector<64x128xf32>
    %cst_17 = arith.constant dense<0.000000e+00> : vector<16x128xf32>
    %13 = tpu.matmul %10, %12, %cst_17 {dimension_numbers = #tpu.dot_dimension_numbers<[1], [0], [0], [1], [0, 0, 1, 1], [], []>} : vector<16x64xf32>, vector<64x128xf32>, vector<16x128xf32> -> vector<16x128xf32>
    %14 = arith.addf %9, %13 : vector<16x128xf32>
    %c2 = arith.constant 2 : index
    %c0_18 = arith.constant 0 : index
    %15 = vector.load %arg8[%c2, %c0_18] : memref<18x64xf32, #tpu.memory_space<vmem>>, vector<16x64xf32>
    %c2_19 = arith.constant 2 : index
    %c0_20 = arith.constant 0 : index
    %c0_21 = arith.constant 0 : index
    %16 = vector.load %arg2[%c2_19, %c0_20, %c0_21] : memref<3x64x128xf32, #tpu.memory_space<vmem>>, vector<1x64x128xf32>
    %17 = vector.shape_cast %16 : vector<1x64x128xf32> to vector<64x128xf32>
    %cst_22 = arith.constant dense<0.000000e+00> : vector<16x128xf32>
    %18 = tpu.matmul %15, %17, %cst_22 {dimension_numbers = #tpu.dot_dimension_numbers<[1], [0], [0], [1], [0, 0, 1, 1], [], []>} : vector<16x64xf32>, vector<64x128xf32>, vector<16x128xf32> -> vector<16x128xf32>
    %19 = arith.addf %14, %18 : vector<16x128xf32>
    %c0_23 = arith.constant 0 : index
    %c0_24 = arith.constant 0 : index
    %20 = vector.load %arg3[%c0_23, %c0_24] : memref<1x128xf32, #tpu.memory_space<vmem>>, vector<1x128xf32>
    %21 = vector.broadcast %20 : vector<1x128xf32> to vector<16x128xf32>
    %22 = arith.addf %19, %21 : vector<16x128xf32>
    %c0_25 = arith.constant 0 : index
    %c0_26 = arith.constant 0 : index
    %c0_27 = arith.constant 0 : index
    %23 = vector.load %arg6[%c0_25, %c0_26, %c0_27] : memref<1x18x128xf32, #tpu.memory_space<vmem>>, vector<1x16x128xf32>
    %24 = vector.shape_cast %23 : vector<1x16x128xf32> to vector<16x128xf32>
    %25 = vector.shape_cast %22 : vector<16x128xf32> to vector<1x16x128xf32>
    tpu.vector_store %arg6[%c0_25, %c0_26, %c0_27], %25 {strides = array<i32>} : memref<1x18x128xf32, #tpu.memory_space<vmem>>, vector<1x16x128xf32>,
    %cst_28 = arith.constant dense<0.000000e+00> : vector<128xf32>
    %26 = vector.multi_reduction <add>, %22, %cst_28 [0] : vector<16x128xf32> to vector<128xf32>
    %27 = vector.shape_cast %26 : vector<128xf32> to vector<1x128xf32>
    %c0_29 = arith.constant 0 : index
    %c16 = arith.constant 16 : index
    %c0_30 = arith.constant 0 : index
    %28 = vector.load %arg6[%c0_29, %c16, %c0_30] : memref<1x18x128xf32, #tpu.memory_space<vmem>>, vector<1x1x128xf32>
    %29 = vector.shape_cast %28 : vector<1x1x128xf32> to vector<1x128xf32>
    %30 = vector.shape_cast %27 : vector<1x128xf32> to vector<1x1x128xf32>
    tpu.vector_store %arg6[%c0_29, %c16, %c0_30], %30 {strides = array<i32>} : memref<1x18x128xf32, #tpu.memory_space<vmem>>, vector<1x1x128xf32>,
    %31 = arith.mulf %22, %22 : vector<16x128xf32>
    %cst_31 = arith.constant dense<0.000000e+00> : vector<128xf32>
    %32 = vector.multi_reduction <add>, %31, %cst_31 [0] : vector<16x128xf32> to vector<128xf32>
    %33 = vector.shape_cast %32 : vector<128xf32> to vector<1x128xf32>
    %c0_32 = arith.constant 0 : index
    %c17_33 = arith.constant 17 : index
    %c0_34 = arith.constant 0 : index
    %34 = vector.load %arg6[%c0_32, %c17_33, %c0_34] : memref<1x18x128xf32, #tpu.memory_space<vmem>>, vector<1x1x128xf32>
    %35 = vector.shape_cast %34 : vector<1x1x128xf32> to vector<1x128xf32>
    %36 = vector.shape_cast %33 : vector<1x128xf32> to vector<1x1x128xf32>
    tpu.vector_store %arg6[%c0_32, %c17_33, %c0_34], %36 {strides = array<i32>} : memref<1x18x128xf32, #tpu.memory_space<vmem>>, vector<1x1x128xf32>,
    %c0_35 = arith.constant 0 : index
    %c0_36 = arith.constant 0 : index
    %37 = vector.load %arg4[%c0_35, %c0_36] : memref<64x128xf32, #tpu.memory_space<vmem>>, vector<64x128xf32>
    %cst_37 = arith.constant dense<0.000000e+00> : vector<16x128xf32>
    %38 = tpu.matmul %1, %37, %cst_37 {dimension_numbers = #tpu.dot_dimension_numbers<[1], [0], [0], [1], [0, 0, 1, 1], [], []>} : vector<16x64xf32>, vector<64x128xf32>, vector<16x128xf32> -> vector<16x128xf32>
    %c0_38 = arith.constant 0 : index
    %c0_39 = arith.constant 0 : index
    %39 = vector.load %arg5[%c0_38, %c0_39] : memref<1x128xf32, #tpu.memory_space<vmem>>, vector<1x128xf32>
    %40 = vector.broadcast %39 : vector<1x128xf32> to vector<16x128xf32>
    %41 = arith.addf %38, %40 : vector<16x128xf32>
    %c0_40 = arith.constant 0 : index
    %c0_41 = arith.constant 0 : index
    %c0_42 = arith.constant 0 : index
    %42 = vector.load %arg7[%c0_40, %c0_41, %c0_42] : memref<1x18x128xf32, #tpu.memory_space<vmem>>, vector<1x16x128xf32>
    %43 = vector.shape_cast %42 : vector<1x16x128xf32> to vector<16x128xf32>
    %44 = vector.shape_cast %41 : vector<16x128xf32> to vector<1x16x128xf32>
    tpu.vector_store %arg7[%c0_40, %c0_41, %c0_42], %44 {strides = array<i32>} : memref<1x18x128xf32, #tpu.memory_space<vmem>>, vector<1x16x128xf32>,
    %cst_43 = arith.constant dense<0.000000e+00> : vector<128xf32>
    %45 = vector.multi_reduction <add>, %41, %cst_43 [0] : vector<16x128xf32> to vector<128xf32>
    %46 = vector.shape_cast %45 : vector<128xf32> to vector<1x128xf32>
    %c0_44 = arith.constant 0 : index
    %c16_45 = arith.constant 16 : index
    %c0_46 = arith.constant 0 : index
    %47 = vector.load %arg7[%c0_44, %c16_45, %c0_46] : memref<1x18x128xf32, #tpu.memory_space<vmem>>, vector<1x1x128xf32>
    %48 = vector.shape_cast %47 : vector<1x1x128xf32> to vector<1x128xf32>
    %49 = vector.shape_cast %46 : vector<1x128xf32> to vector<1x1x128xf32>
    tpu.vector_store %arg7[%c0_44, %c16_45, %c0_46], %49 {strides = array<i32>} : memref<1x18x128xf32, #tpu.memory_space<vmem>>, vector<1x1x128xf32>,
    %50 = arith.mulf %41, %41 : vector<16x128xf32>
    %cst_47 = arith.constant dense<0.000000e+00> : vector<128xf32>
    %51 = vector.multi_reduction <add>, %50, %cst_47 [0] : vector<16x128xf32> to vector<128xf32>
    %52 = vector.shape_cast %51 : vector<128xf32> to vector<1x128xf32>
    %c0_48 = arith.constant 0 : index
    %c17_49 = arith.constant 17 : index
    %c0_50 = arith.constant 0 : index
    %53 = vector.load %arg7[%c0_48, %c17_49, %c0_50] : memref<1x18x128xf32, #tpu.memory_space<vmem>>, vector<1x1x128xf32>
    %54 = vector.shape_cast %53 : vector<1x1x128xf32> to vector<1x128xf32>
    %55 = vector.shape_cast %52 : vector<1x128xf32> to vector<1x1x128xf32>
    tpu.vector_store %arg7[%c0_48, %c17_49, %c0_50], %55 {strides = array<i32>} : memref<1x18x128xf32, #tpu.memory_space<vmem>>, vector<1x1x128xf32>,
    return
  }
  func.func @transform_0(%arg0: i32) -> (i32, i32, i32) {
    %c0_i32 = arith.constant 0 : i32
    %c0_i32_0 = arith.constant 0 : i32
    %c0_i32_1 = arith.constant 0 : i32
    return %arg0, %c0_i32, %c0_i32_0 : i32, i32, i32
  }
  func.func @transform_1(%arg0: i32) -> (i32, i32, i32) {
    %c0_i32 = arith.constant 0 : i32
    %c0_i32_0 = arith.constant 0 : i32
    %c0_i32_1 = arith.constant 0 : i32
    %c0_i32_2 = arith.constant 0 : i32
    return %c0_i32, %c0_i32_0, %c0_i32_1 : i32, i32, i32
  }
  func.func @transform_2(%arg0: i32) -> (i32, i32) {
    %c0_i32 = arith.constant 0 : i32
    %c0_i32_0 = arith.constant 0 : i32
    %c0_i32_1 = arith.constant 0 : i32
    return %c0_i32, %c0_i32_0 : i32, i32
  }
  func.func @transform_3(%arg0: i32) -> (i32, i32) {
    %c0_i32 = arith.constant 0 : i32
    %c0_i32_0 = arith.constant 0 : i32
    %c0_i32_1 = arith.constant 0 : i32
    return %c0_i32, %c0_i32_0 : i32, i32
  }
  func.func @transform_4(%arg0: i32) -> (i32, i32) {
    %c0_i32 = arith.constant 0 : i32
    %c0_i32_0 = arith.constant 0 : i32
    %c0_i32_1 = arith.constant 0 : i32
    return %c0_i32, %c0_i32_0 : i32, i32
  }
  func.func @transform_5(%arg0: i32) -> (i32, i32, i32) {
    %c0_i32 = arith.constant 0 : i32
    %c0_i32_0 = arith.constant 0 : i32
    %c0_i32_1 = arith.constant 0 : i32
    return %arg0, %c0_i32, %c0_i32_0 : i32, i32, i32
  }
  func.func @transform_6(%arg0: i32) -> (i32, i32, i32) {
    %c0_i32 = arith.constant 0 : i32
    %c0_i32_0 = arith.constant 0 : i32
    %c0_i32_1 = arith.constant 0 : i32
    return %arg0, %c0_i32, %c0_i32_0 : i32, i32, i32
  }
}

module attributes {stable_mosaic.version = 11 : i64} {
  func.func @kernel(%arg0: i32, %arg1: memref<1x18x128xf32, #tpu.memory_space<vmem>>, %arg2: memref<1x128xf32, #tpu.memory_space<vmem>>, %arg3: memref<1x128xf32, #tpu.memory_space<vmem>>, %arg4: memref<3x128x128xf32, #tpu.memory_space<vmem>>, %arg5: memref<1x128xf32, #tpu.memory_space<vmem>>, %arg6: memref<1x18x128xf32, #tpu.memory_space<vmem>>, %arg7: memref<18x128xf32, #tpu.memory_space<vmem>>) attributes {dimension_semantics = [#tpu.dimension_semantics<parallel>], iteration_bounds = array<i64: 2>, scalar_prefetch = 0 : i64, scratch_operands = 1 : i64, tpu.core_type = #tpu.core_type<tc>, window_params = [{transform_indices = @transform_0, window_bounds = array<i64: 1, 18, 128>}, {pipeline_mode = #tpu.pipeline_mode<synchronous>, transform_indices = @transform_1, window_bounds = array<i64: 1, 128>}, {pipeline_mode = #tpu.pipeline_mode<synchronous>, transform_indices = @transform_2, window_bounds = array<i64: 1, 128>}, {pipeline_mode = #tpu.pipeline_mode<synchronous>, transform_indices = @transform_3, window_bounds = array<i64: 3, 128, 128>}, {pipeline_mode = #tpu.pipeline_mode<synchronous>, transform_indices = @transform_4, window_bounds = array<i64: 1, 128>}, {transform_indices = @transform_5, window_bounds = array<i64: 1, 18, 128>}]} {
    %c0 = arith.constant 0 : index
    %c0_0 = arith.constant 0 : index
    %c0_1 = arith.constant 0 : index
    %0 = vector.load %arg1[%c0, %c0_0, %c0_1] : memref<1x18x128xf32, #tpu.memory_space<vmem>>, vector<1x16x128xf32>
    %1 = vector.shape_cast %0 : vector<1x16x128xf32> to vector<16x128xf32>
    %c0_2 = arith.constant 0 : index
    %c0_3 = arith.constant 0 : index
    %2 = vector.load %arg2[%c0_2, %c0_3] : memref<1x128xf32, #tpu.memory_space<vmem>>, vector<1x128xf32>
    %3 = vector.broadcast %2 : vector<1x128xf32> to vector<16x128xf32>
    %4 = arith.mulf %1, %3 : vector<16x128xf32>
    %c0_4 = arith.constant 0 : index
    %c0_5 = arith.constant 0 : index
    %5 = vector.load %arg3[%c0_4, %c0_5] : memref<1x128xf32, #tpu.memory_space<vmem>>, vector<1x128xf32>
    %6 = vector.broadcast %5 : vector<1x128xf32> to vector<16x128xf32>
    %7 = arith.addf %4, %6 : vector<16x128xf32>
    %cst = arith.constant 0.000000e+00 : f32
    %8 = vector.broadcast %cst : f32 to vector<16x128xf32>
    %9 = arith.maximumf %7, %8 : vector<16x128xf32>
    %cst_6 = arith.constant 0.000000e+00 : f32
    %10 = vector.broadcast %cst_6 : f32 to vector<1x128xf32>
    %c0_7 = arith.constant 0 : index
    %c0_8 = arith.constant 0 : index
    %11 = vector.load %arg7[%c0_7, %c0_8] : memref<18x128xf32, #tpu.memory_space<vmem>>, vector<1x128xf32>
    tpu.vector_store %arg7[%c0_7, %c0_8], %10 {strides = array<i32>} : memref<18x128xf32, #tpu.memory_space<vmem>>, vector<1x128xf32>,
    %c17 = arith.constant 17 : index
    %c0_9 = arith.constant 0 : index
    %12 = vector.load %arg7[%c17, %c0_9] : memref<18x128xf32, #tpu.memory_space<vmem>>, vector<1x128xf32>
    tpu.vector_store %arg7[%c17, %c0_9], %10 {strides = array<i32>} : memref<18x128xf32, #tpu.memory_space<vmem>>, vector<1x128xf32>,
    %c1 = arith.constant 1 : index
    %c0_10 = arith.constant 0 : index
    %13 = vector.load %arg7[%c1, %c0_10] : memref<18x128xf32, #tpu.memory_space<vmem>>, vector<16x128xf32>
    tpu.vector_store %arg7[%c1, %c0_10], %9 {strides = array<i32>} : memref<18x128xf32, #tpu.memory_space<vmem>>, vector<16x128xf32>,
    %c0_11 = arith.constant 0 : index
    %c0_12 = arith.constant 0 : index
    %14 = vector.load %arg7[%c0_11, %c0_12] : memref<18x128xf32, #tpu.memory_space<vmem>>, vector<16x128xf32>
    %c0_13 = arith.constant 0 : index
    %c0_14 = arith.constant 0 : index
    %c0_15 = arith.constant 0 : index
    %15 = vector.load %arg4[%c0_13, %c0_14, %c0_15] : memref<3x128x128xf32, #tpu.memory_space<vmem>>, vector<1x128x128xf32>
    %16 = vector.shape_cast %15 : vector<1x128x128xf32> to vector<128x128xf32>
    %cst_16 = arith.constant dense<0.000000e+00> : vector<16x128xf32>
    %17 = tpu.matmul %14, %16, %cst_16 {dimension_numbers = #tpu.dot_dimension_numbers<[1], [0], [0], [1], [0, 0, 1, 1], [], []>} : vector<16x128xf32>, vector<128x128xf32>, vector<16x128xf32> -> vector<16x128xf32>
    %c1_17 = arith.constant 1 : index
    %c0_18 = arith.constant 0 : index
    %18 = vector.load %arg7[%c1_17, %c0_18] : memref<18x128xf32, #tpu.memory_space<vmem>>, vector<16x128xf32>
    %c1_19 = arith.constant 1 : index
    %c0_20 = arith.constant 0 : index
    %c0_21 = arith.constant 0 : index
    %19 = vector.load %arg4[%c1_19, %c0_20, %c0_21] : memref<3x128x128xf32, #tpu.memory_space<vmem>>, vector<1x128x128xf32>
    %20 = vector.shape_cast %19 : vector<1x128x128xf32> to vector<128x128xf32>
    %cst_22 = arith.constant dense<0.000000e+00> : vector<16x128xf32>
    %21 = tpu.matmul %18, %20, %cst_22 {dimension_numbers = #tpu.dot_dimension_numbers<[1], [0], [0], [1], [0, 0, 1, 1], [], []>} : vector<16x128xf32>, vector<128x128xf32>, vector<16x128xf32> -> vector<16x128xf32>
    %22 = arith.addf %17, %21 : vector<16x128xf32>
    %c2 = arith.constant 2 : index
    %c0_23 = arith.constant 0 : index
    %23 = vector.load %arg7[%c2, %c0_23] : memref<18x128xf32, #tpu.memory_space<vmem>>, vector<16x128xf32>
    %c2_24 = arith.constant 2 : index
    %c0_25 = arith.constant 0 : index
    %c0_26 = arith.constant 0 : index
    %24 = vector.load %arg4[%c2_24, %c0_25, %c0_26] : memref<3x128x128xf32, #tpu.memory_space<vmem>>, vector<1x128x128xf32>
    %25 = vector.shape_cast %24 : vector<1x128x128xf32> to vector<128x128xf32>
    %cst_27 = arith.constant dense<0.000000e+00> : vector<16x128xf32>
    %26 = tpu.matmul %23, %25, %cst_27 {dimension_numbers = #tpu.dot_dimension_numbers<[1], [0], [0], [1], [0, 0, 1, 1], [], []>} : vector<16x128xf32>, vector<128x128xf32>, vector<16x128xf32> -> vector<16x128xf32>
    %27 = arith.addf %22, %26 : vector<16x128xf32>
    %c0_28 = arith.constant 0 : index
    %c0_29 = arith.constant 0 : index
    %28 = vector.load %arg5[%c0_28, %c0_29] : memref<1x128xf32, #tpu.memory_space<vmem>>, vector<1x128xf32>
    %29 = vector.broadcast %28 : vector<1x128xf32> to vector<16x128xf32>
    %30 = arith.addf %27, %29 : vector<16x128xf32>
    %c0_30 = arith.constant 0 : index
    %c0_31 = arith.constant 0 : index
    %c0_32 = arith.constant 0 : index
    %31 = vector.load %arg6[%c0_30, %c0_31, %c0_32] : memref<1x18x128xf32, #tpu.memory_space<vmem>>, vector<1x16x128xf32>
    %32 = vector.shape_cast %31 : vector<1x16x128xf32> to vector<16x128xf32>
    %33 = vector.shape_cast %30 : vector<16x128xf32> to vector<1x16x128xf32>
    tpu.vector_store %arg6[%c0_30, %c0_31, %c0_32], %33 {strides = array<i32>} : memref<1x18x128xf32, #tpu.memory_space<vmem>>, vector<1x16x128xf32>,
    %cst_33 = arith.constant dense<0.000000e+00> : vector<128xf32>
    %34 = vector.multi_reduction <add>, %30, %cst_33 [0] : vector<16x128xf32> to vector<128xf32>
    %35 = vector.shape_cast %34 : vector<128xf32> to vector<1x128xf32>
    %c0_34 = arith.constant 0 : index
    %c16 = arith.constant 16 : index
    %c0_35 = arith.constant 0 : index
    %36 = vector.load %arg6[%c0_34, %c16, %c0_35] : memref<1x18x128xf32, #tpu.memory_space<vmem>>, vector<1x1x128xf32>
    %37 = vector.shape_cast %36 : vector<1x1x128xf32> to vector<1x128xf32>
    %38 = vector.shape_cast %35 : vector<1x128xf32> to vector<1x1x128xf32>
    tpu.vector_store %arg6[%c0_34, %c16, %c0_35], %38 {strides = array<i32>} : memref<1x18x128xf32, #tpu.memory_space<vmem>>, vector<1x1x128xf32>,
    %39 = arith.mulf %30, %30 : vector<16x128xf32>
    %cst_36 = arith.constant dense<0.000000e+00> : vector<128xf32>
    %40 = vector.multi_reduction <add>, %39, %cst_36 [0] : vector<16x128xf32> to vector<128xf32>
    %41 = vector.shape_cast %40 : vector<128xf32> to vector<1x128xf32>
    %c0_37 = arith.constant 0 : index
    %c17_38 = arith.constant 17 : index
    %c0_39 = arith.constant 0 : index
    %42 = vector.load %arg6[%c0_37, %c17_38, %c0_39] : memref<1x18x128xf32, #tpu.memory_space<vmem>>, vector<1x1x128xf32>
    %43 = vector.shape_cast %42 : vector<1x1x128xf32> to vector<1x128xf32>
    %44 = vector.shape_cast %41 : vector<1x128xf32> to vector<1x1x128xf32>
    tpu.vector_store %arg6[%c0_37, %c17_38, %c0_39], %44 {strides = array<i32>} : memref<1x18x128xf32, #tpu.memory_space<vmem>>, vector<1x1x128xf32>,
    return
  }
  func.func @transform_0(%arg0: i32) -> (i32, i32, i32) {
    %c0_i32 = arith.constant 0 : i32
    %c0_i32_0 = arith.constant 0 : i32
    %c0_i32_1 = arith.constant 0 : i32
    return %arg0, %c0_i32, %c0_i32_0 : i32, i32, i32
  }
  func.func @transform_1(%arg0: i32) -> (i32, i32) {
    %c0_i32 = arith.constant 0 : i32
    %c0_i32_0 = arith.constant 0 : i32
    %c0_i32_1 = arith.constant 0 : i32
    return %c0_i32, %c0_i32_0 : i32, i32
  }
  func.func @transform_2(%arg0: i32) -> (i32, i32) {
    %c0_i32 = arith.constant 0 : i32
    %c0_i32_0 = arith.constant 0 : i32
    %c0_i32_1 = arith.constant 0 : i32
    return %c0_i32, %c0_i32_0 : i32, i32
  }
  func.func @transform_3(%arg0: i32) -> (i32, i32, i32) {
    %c0_i32 = arith.constant 0 : i32
    %c0_i32_0 = arith.constant 0 : i32
    %c0_i32_1 = arith.constant 0 : i32
    %c0_i32_2 = arith.constant 0 : i32
    return %c0_i32, %c0_i32_0, %c0_i32_1 : i32, i32, i32
  }
  func.func @transform_4(%arg0: i32) -> (i32, i32) {
    %c0_i32 = arith.constant 0 : i32
    %c0_i32_0 = arith.constant 0 : i32
    %c0_i32_1 = arith.constant 0 : i32
    return %c0_i32, %c0_i32_0 : i32, i32
  }
  func.func @transform_5(%arg0: i32) -> (i32, i32, i32) {
    %c0_i32 = arith.constant 0 : i32
    %c0_i32_0 = arith.constant 0 : i32
    %c0_i32_1 = arith.constant 0 : i32
    return %arg0, %c0_i32, %c0_i32_0 : i32, i32, i32
  }
}

</mosaic_0001>

<bundles_post_ra>
// kernel: tile.44
= control target key start
LH: loop header
LB: loop body
LE: loop exit
PB: predicated region body
PF: predicated region fallthrough
CT: control target
= control target key end

     0   :  { %s28_s0 = inlined_call_operand.vmem [shape: f32[8], index: 0, kind: input, shape index: {}]   ;;  %s29_s1 = inlined_call_operand.vmem [shape: f32[16,8], index: 1, kind: output, shape index: {}]  }
   0x1   :  { %v4_v0 = vld [vmem:[%s28_s0] ss:$0 sm:$0xff] }
   0x2   :  { %5 = vst [vmem:[%s29_s1] sm:$0xff] %v4_v0  ;;  %8 = vst [vmem:[%s29_s1 + $0x8] sm:$0xff] %v4_v0 }

// kernel: tile.45
= control target key start
LH: loop header
LB: loop body
LE: loop exit
PB: predicated region body
PF: predicated region fallthrough
CT: control target
= control target key end

     0   :  { %s131_s10 = smov 120   ;;  %s132_s11 = smov 104   ;;  %vm3_vm0 = vcmask 64512   ;;  %vm9_vm1 = vcmask 1048512   ;;  %vm15_vm2 = vcmask 982912   ;;  %vm21_vm3 = vcmask 917312   ;;  %s207_s0 = inlined_call_operand.vmem [shape: f32[16,8], index: 0, kind: input, shape index: {}]   ;;  %s208_s1 = inlined_call_operand.vmem [shape: f32[1,128], index: 1, kind: output, shape index: {}]  }
   0x1   :  { %v101_v0 = vld [vmem:[%s207_s0 + $0xf] sm:$0x1]   ;;  %v103_v1 = vld [vmem:[%s207_s0 + $0xd] sm:$0x1]   ;;  %v102_v2 = vld [vmem:[%s207_s0 + $0xe] sm:$0x1]  }
   0x2   :  { %7 = vrot.lane.b32.xlu0 %v101_v0, %s131_s10  ;;  %19 = vrot.lane.b32.xlu1 %v103_v1, %s132_s11  ;;  %v104_v3 = vld [vmem:[%s207_s0 + $0xc] sm:$0x1]   ;;  %s133_s16 = smov 112   ;;  %s134_s17 = smov 96   ;;  %v105_v4 = vld [vmem:[%s207_s0 + $0xb] sm:$0x1]  }
   0x3   :  { %v106_v5 = vld [vmem:[%s207_s0 + $0xa] sm:$0x1]   ;;  %v2_v6 = vld [vmem:[%s207_s0] sm:$0x1]   ;;  %s135_s24 = smov 88   ;;  %s136_s25 = smov 80  }
   0x4   :  { %4 = vst.msk [vmem:[#allocation0] sm:$0x1] %vm3_vm0, %v2_v6   ;;  %v107_v7 = vld [vmem:[%s207_s0 + $0x9] sm:$0x1]   ;;  %v108_v8 = vld [vmem:[%s207_s0 + $0x8] sm:$0x1]  }
   0x5   :  { %s137_s30 = smov 72   ;;  %s138_s2 = smov 64   ;;  %v109_v9 = vld [vmem:[%s207_s0 + $0x7] sm:$0x1]   ;;  %v110_v10 = vld [vmem:[%s207_s0 + $0x6] sm:$0x1]  }
   0x6   :  { %13 = vrot.lane.b32.xlu0 %v102_v2, %s133_s16  ;;  %25 = vrot.lane.b32.xlu1 %v104_v3, %s134_s17  ;;  %s139_s7 = smov 56   ;;  %s140_s8 = smov 48   ;;  %v111_v11 = vld [vmem:[%s207_s0 + $0x5] sm:$0x1]   ;;  %v112_v12 = vld [vmem:[%s207_s0 + $0x4] sm:$0x1]  }
   0x7   :  { %s141_s13 = smov 40   ;;  %s142_s14 = smov 32   ;;  %v113_v13 = vld [vmem:[%s207_s0 + $0x3] sm:$0x1]   ;;  %v114_v14 = vld [vmem:[%s207_s0 + $0x2] sm:$0x1]  }
   0x8   :  { %s143_s19 = smov 24   ;;  %s144_s20 = smov 16   ;;  %v115_v15 = vld [vmem:[%s207_s0 + $0x1] sm:$0x1]   ;;  %vm27_vm4 = vcmask 851712   ;;  %vm33_vm5 = vcmask 786112  }
   0x9   :  { %s145_s0 = smov 8   ;;  %vm39_vm6 = vcmask 720512   ;;  %vm45_vm7 = vcmask 654912   ;;  %vm51_vm8 = vcmask 589312   ;;  %vm57_vm9 = vcmask 523712  }
   0xa   :  { %31 = vrot.lane.b32.xlu0 %v105_v4, %s135_s24  ;;  %37 = vrot.lane.b32.xlu1 %v106_v5, %s136_s25  ;;  %vm63_vm10 = vcmask 458112   ;;  %vm69_vm11 = vcmask 392512   ;;  %vm75_vm12 = vcmask 326912   ;;  %vm81_vm13 = vcmask 261312  }
   0xb   :  { %vm87_vm14 = vcmask 195712   ;;  %vm93_vm15 = vcmask 130112  }
   0xe   :  { %43 = vrot.lane.b32.xlu0 %v107_v7, %s137_s30  ;;  %49 = vrot.lane.b32.xlu1 %v108_v8, %s138_s2 }
  0x12   :  { %55 = vrot.lane.b32.xlu0 %v109_v9, %s139_s7  ;;  %61 = vrot.lane.b32.xlu1 %v110_v10, %s140_s8 }
  0x16   :  { %67 = vrot.lane.b32.xlu0 %v111_v11, %s141_s13  ;;  %73 = vrot.lane.b32.xlu1 %v112_v12, %s142_s14 }
  0x1a   :  { %79 = vrot.lane.b32.xlu0 %v113_v13, %s143_s19  ;;  %85 = vrot.lane.b32.xlu1 %v114_v14, %s144_s20 }
  0x1e   :  { %91 = vrot.lane.b32.xlu0 %v115_v15, %s145_s0 }
  0x74   :  { %v8_v16 = vpop.permute.xlu0 %7   ;;  %v20_v17 = vpop.permute.xlu1 %19  }
  0x75   :  { %10 = vst.msk [vmem:[#allocation0] sm:$0x1] %vm9_vm1, %v8_v16  }
  0x78   :  { %v14_v18 = vpop.permute.xlu0 %13   ;;  %v26_v19 = vpop.permute.xlu1 %25  }
  0x79   :  { %16 = vst.msk [vmem:[#allocation0] sm:$0x1] %vm15_vm2, %v14_v18  }
  0x7a   :  { %22 = vst.msk [vmem:[#allocation0] sm:$0x1] %vm21_vm3, %v20_v17  }
  0x7b   :  { %28 = vst.msk [vmem:[#allocation0] sm:$0x1] %vm27_vm4, %v26_v19  }
  0x7c   :  { %v32_v20 = vpop.permute.xlu0 %31   ;;  %v38_v21 = vpop.permute.xlu1 %37  }
  0x7d   :  { %34 = vst.msk [vmem:[#allocation0] sm:$0x1] %vm33_vm5, %v32_v20  }
  0x7e   :  { %40 = vst.msk [vmem:[#allocation0] sm:$0x1] %vm39_vm6, %v38_v21  }
  0x80   :  { %v44_v22 = vpop.permute.xlu0 %43   ;;  %v50_v23 = vpop.permute.xlu1 %49  }
  0x81   :  { %46 = vst.msk [vmem:[#allocation0] sm:$0x1] %vm45_vm7, %v44_v22  }
  0x82   :  { %52 = vst.msk [vmem:[#allocation0] sm:$0x1] %vm51_vm8, %v50_v23  }
  0x84   :  { %v56_v24 = vpop.permute.xlu0 %55   ;;  %v62_v25 = vpop.permute.xlu1 %61  }
  0x85   :  { %58 = vst.msk [vmem:[#allocation0] sm:$0x1] %vm57_vm9, %v56_v24  }
  0x86   :  { %64 = vst.msk [vmem:[#allocation0] sm:$0x1] %vm63_vm10, %v62_v25  }
  0x88   :  { %v68_v26 = vpop.permute.xlu0 %67   ;;  %v74_v27 = vpop.permute.xlu1 %73  }
  0x89   :  { %70 = vst.msk [vmem:[#allocation0] sm:$0x1] %vm69_vm11, %v68_v26  }
  0x8a   :  { %76 = vst.msk [vmem:[#allocation0] sm:$0x1] %vm75_vm12, %v74_v27  }
  0x8c   :  { %v80_v28 = vpop.permute.xlu0 %79   ;;  %v86_v29 = vpop.permute.xlu1 %85  }
  0x8d   :  { %82 = vst.msk [vmem:[#allocation0] sm:$0x1] %vm81_vm13, %v80_v28  }
  0x8e   :  { %88 = vst.msk [vmem:[#allocation0] sm:$0x1] %vm87_vm14, %v86_v29  }
  0x90   :  { %v92_v30 = vpop.permute.xlu0 %91  }
  0x91   :  { %94 = vst.msk [vmem:[#allocation0] sm:$0x1] %vm93_vm15, %v92_v30  }
  0x98   :  { %v98_v31 = vld [vmem:[#allocation0] sm:$0x1] }
  0x99   :  { %100 = vst [vmem:[%s208_s1] sm:$0x1] %v98_v31 }

// kernel: block_forward.2
= control target key start
LH: loop header
LB: loop body
LE: loop exit
PB: predicated region body
PF: predicated region fallthrough
CT: control target
= control target key end

     0   :  { %s1059_s21 = smov 0   ;;  %s1211_s0 = inlined_call_operand.vmem [shape: f32[2,16,64], index: 0, kind: input, shape index: {}]   ;;  %s1212_s1 = inlined_call_operand.vmem [shape: f32[3,64,128], index: 1, kind: input, shape index: {}]   ;;  %s1213_s2 = inlined_call_operand.vmem [shape: f32[1,128], index: 2, kind: input, shape index: {}]   ;;  %s1214_s3 = inlined_call_operand.vmem [shape: f32[64,128], index: 3, kind: input, shape index: {}]   ;;  %s1215_s4 = inlined_call_operand.vmem [shape: f32[1,128], index: 4, kind: input, shape index: {}]   ;;  %s1216_s5 = inlined_call_operand.vmem [shape: f32[2,18,128], index: 5, kind: output, shape index: {0}]   ;;  %s1217_s6 = inlined_call_operand.vmem [shape: f32[2,18,128], index: 6, kind: output, shape index: {1}]  }
   0x1 LB: > { %s783_s22 = sadd.s32 4294967295, %s1021_s21   ;;  %p787_p0 = scmp.ge.s32.totalorder %s1021_s21, 1  ;;  %s1021_s21 = sphi %s1059_s21, %s17_s21  }
   0x2   : > { %p215_p1 = scmp.lt.s32.totalorder %s1021_s21, 3 }
   0x4   : > { %p216_p2 = pnand %p787_p0, %p215_p1 }
   0x5   : > { %v792_v0 = vld [vmem:[%s1212_s1 + $0x40] sm:$0xff] (!%p216_p2)  ;;  %v793_v1 = vld [vmem:[%s1212_s1 + $0x48] sm:$0xff] (!%p216_p2)  ;;  %p250_p3 = scmp.lt.s32.totalorder (!%p216_p2), %s783_s22, 1  ;;  %vm267_vm0 = vcmask (!%p216_p2), 516096   ;;  %v794_v5 = vld [vmem:[%s1212_s1 + $0x50] sm:$0xff] (!%p216_p2)  ;;  %v1023_v12 = vmov (!%p216_p2), 0.0  }
   0x6   : > { %219 = sbr.rel (%p216_p2) target bundleno = 277 (0x115), region = 40  ;;  %v275_v2 = vld [vmem:[%s1212_s1] sm:$0xff] (!%p216_p2)  ;;  %v937_v3 = vpack.c.bf16 (!%p216_p2), %v793_v1, %v792_v0  ;;  %v276_v4 = vld [vmem:[%s1212_s1 + $0x8] sm:$0xff] (!%p216_p2)  ;;  %v795_v6 = vld [vmem:[%s1212_s1 + $0x58] sm:$0xff] (!%p216_p2)  ;;  %268 = vst.msk [vmem:[#allocation2] sm:$0x1] (!%p216_p2), %vm267_vm0, %v1023_v12 }
   0x7   : > { %v953_v7 = vpack.c.bf16 (!%p216_p2), %v276_v4, %v275_v2  ;;  %v941_v8 = vpack.c.bf16 (!%p216_p2), %v795_v6, %v794_v5  ;;  %v277_v9 = vld [vmem:[%s1212_s1 + $0x10] sm:$0xff] (!%p216_p2)  ;;  %v278_v10 = vld [vmem:[%s1212_s1 + $0x18] sm:$0xff] (!%p216_p2)  ;;  %v796_v11 = vld [vmem:[%s1212_s1 + $0x60] sm:$0xff] (!%p216_p2)  ;;  %269 = vst.msk [vmem:[#allocation2 + $0x11] sm:$0x1] (!%p216_p2), %vm267_vm0, %v1023_v12  ;;  %vm270_vm1 = vcmask (!%p216_p2), 523264  }
   0x8   : > { %938 = vmatprep.subr.bf16.mxu1 (!%p216_p2), %v937_v3  ;;  %v957_v13 = vpack.c.bf16 (!%p216_p2), %v278_v10, %v277_v9  ;;  %v797_v14 = vld [vmem:[%s1212_s1 + $0x68] sm:$0xff] (!%p216_p2)  ;;  %v279_v15 = vld [vmem:[%s1212_s1 + $0x20] sm:$0xff] (!%p216_p2)  ;;  %v798_v18 = vld [vmem:[%s1212_s1 + $0x70] sm:$0xff] (!%p216_p2) }
   0x9   : > { %v280_v16 = vld [vmem:[%s1212_s1 + $0x28] sm:$0xff] (!%p216_p2)  ;;  %954 = vmatprep.subr.bf16.mxu0 (!%p216_p2), %v953_v7  ;;  %940 = vmatpush3.bf16.msra.mxu1 (!%p216_p2), %v937_v3  ;;  %v945_v17 = vpack.c.bf16 (!%p216_p2), %v797_v14, %v796_v11  ;;  %v799_v20 = vld [vmem:[%s1212_s1 + $0x78] sm:$0xff] (!%p216_p2)  ;;  %v281_v23 = vld [vmem:[%s1212_s1 + $0x30] sm:$0xff] (!%p216_p2) }
   0xa   : > { %956 = vmatpush3.bf16.msra.mxu0 (!%p216_p2), %v953_v7  ;;  %942 = vmatprep.subr.bf16.mxu1 (!%p216_p2), %v941_v8  ;;  %v961_v19 = vpack.c.bf16 (!%p216_p2), %v280_v16, %v279_v15  ;;  %v282_v24 = vld [vmem:[%s1212_s1 + $0x38] sm:$0xff] (!%p216_p2)  ;;  %v949_v25 = vpack.c.bf16 (!%p216_p2), %v799_v20, %v798_v18  ;;  %v579_v27 = vld [vmem:[%s1214_s3] sm:$0xff] (!%p216_p2)  ;;  %v580_v28 = vld [vmem:[%s1214_s3 + $0x8] sm:$0xff] (!%p216_p2) }
   0xb   : > { %958 = vmatprep.subr.bf16.mxu0 (!%p216_p2), %v957_v13  ;;  %v965_v26 = vpack.c.bf16 (!%p216_p2), %v282_v24, %v281_v23  ;;  %v804_v29 = vld [vmem:[%s1212_s1 + $0x80] sm:$0xff] (!%p216_p2)  ;;  %v805_v30 = vld [vmem:[%s1212_s1 + $0x88] sm:$0xff] (!%p216_p2)  ;;  %v985_v31 = vpack.c.bf16 (!%p216_p2), %v580_v28, %v579_v27  ;;  %v581_v32 = vld [vmem:[%s1214_s3 + $0x10] sm:$0xff] (!%p216_p2) }
   0xc   : > { %v969_v35 = vpack.c.bf16 (!%p216_p2), %v805_v30, %v804_v29  ;;  %v582_v36 = vld [vmem:[%s1214_s3 + $0x18] sm:$0xff] (!%p216_p2)  ;;  %v806_v37 = vld [vmem:[%s1212_s1 + $0x90] sm:$0xff] (!%p216_p2)  ;;  %v583_v43 = vld [vmem:[%s1214_s3 + $0x20] sm:$0xff] (!%p216_p2) }
   0xd   : > { %s1219_s22 = smov (!%p250_p3, %s783_s22), 1  ;;  %944 = vmatpush3.bf16.msra.mxu1 %v941_v8  ;;  %v807_v38 = vld [vmem:[%s1212_s1 + $0x98] sm:$0xff]  ;;  %v989_v41 = vpack.c.bf16 %v582_v36, %v581_v32  ;;  %v584_v44 = vld [vmem:[%s1214_s3 + $0x28] sm:$0xff]  ;;  %v808_v45 = vld [vmem:[%s1212_s1 + $0xa0] sm:$0xff] }
   0xe   : > { %s820_s25 = sshll.u32 %s1219_s22, 4  ;;  %960 = vmatpush3.bf16.msra.mxu0 %v957_v13  ;;  %946 = vmatprep.subr.bf16.mxu1 %v945_v17  ;;  %v973_v42 = vpack.c.bf16 %v807_v38, %v806_v37  ;;  %v809_v46 = vld [vmem:[%s1212_s1 + $0xa8] sm:$0xff]  ;;  %v993_v48 = vpack.c.bf16 %v584_v44, %v583_v43  ;;  %v585_v50 = vld [vmem:[%s1214_s3 + $0x30] sm:$0xff]  ;;  %v586_v51 = vld [vmem:[%s1214_s3 + $0x38] sm:$0xff] }
   0xf   : > { %s254_s30 = scalar_lea.vmem %s1211_s0, %s820_s25  ;;  %962 = vmatprep.subr.bf16.mxu0 %v961_v19  ;;  %v977_v49 = vpack.c.bf16 %v809_v46, %v808_v45  ;;  %v810_v52 = vld [vmem:[%s1212_s1 + $0xb0] sm:$0xff]  ;;  %v811_v53 = vld [vmem:[%s1212_s1 + $0xb8] sm:$0xff]  ;;  %v997_v54 = vpack.c.bf16 %v586_v51, %v585_v50  ;;  %s1005_s25 = smul.u32 24, %s1219_s22  ;;  %v815_v59 = vld [vmem:[%s1215_s4] ss:$0 sm:$0xff] }
  0x10   : > { %v265_v21 = vld [vmem:[%s254_s30] sm:$0xff]  ;;  %v1115_v22 = vld [vmem:[%s254_s30 + $0x8] sm:$0xff]  ;;  %v981_v55 = vpack.c.bf16 %v811_v53, %v810_v52 }
  0x11   : > { %271 = vst.msk [vmem:[#allocation2 + $0x1] sm:$0xff] %vm270_vm1, %v265_v21  ;;  %272 = vst.msk [vmem:[#allocation2 + $0x9] sm:$0xff] %vm270_vm1, %v1115_v22  ;;  %948 = vmatpush3.bf16.msra.mxu1 %v945_v17  ;;  %s1190_s30 = scalar_lea.vmem %s1217_s6, %s1005_s25  ;;  %v814_v62 = vld [vmem:[%s1213_s2] ss:$0 sm:$0xff]  ;;  %s1198_s10 = scalar_lea.vmem %s1216_s5, %s1005_s25 }
  0x12   : > { %964 = vmatpush3.bf16.msra.mxu0 %v961_v19  ;;  %950 = vmatprep.subr.bf16.mxu1 %v949_v25 }
  0x13   : > { %966 = vmatprep.subr.bf16.mxu0 %v965_v26 }
  0x15   : > { %952 = vmatpush3.bf16.msra.mxu1 %v949_v25 }
  0x16   : > { %968 = vmatpush3.bf16.msra.mxu0 %v965_v26  ;;  %986 = vmatprep.subr.bf16.mxu1 %v985_v31 }
  0x17   : > { %970 = vmatprep.subr.bf16.mxu0 %v969_v35 }
  0x18   : > { %v283_v33 = vld [vmem:[#allocation2 + $0x1] sm:$0xff]  ;;  %v284_v39 = vld [vmem:[#allocation2 + $0x9] sm:$0xff] }
  0x19   : > { %v273_v34 = vld [vmem:[#allocation2] sm:$0xff]  ;;  %877 = vmatprep.mubr.msk.f32.mxu1 %vm270_vm1, %v283_v33  ;;  %v274_v40 = vld [vmem:[#allocation2 + $0x8] sm:$0xff] }
  0x1a   : > { %896 = vmatprep.mubr.msk.f32.mxu0 %vm270_vm1, %v273_v34  ;;  %878 = vmatmul.mubr.msk.f32.vlgmr.msra.gmra.mrb[0].mxu1 %vm270_vm1, %v284_v39  ;;  %v456_v47 = vld [vmem:[#allocation2 + $0x2] sm:$0xff]  ;;  %v457_v56 = vld [vmem:[#allocation2 + $0xa] sm:$0xff] }
  0x1b   : > { %897 = vmatmul.mubr.msk.f32.vlgmr.msra.gmra.mrb[0].mxu0 %vm270_vm1, %v274_v40  ;;  %988 = vmatpush3.bf16.msra.mxu1 %v985_v31 }
  0x1c   : > { %972 = vmatpush3.bf16.msra.mxu0 %v969_v35  ;;  %990 = vmatprep.subr.bf16.mxu1 %v989_v41 }
  0x1d   : > { %974 = vmatprep.subr.bf16.mxu0 %v973_v42  ;;  %915 = vmatprep.mubr.msk.f32.mxu0 %vm270_vm1, %v456_v47 }
  0x1e   : > { %934 = vmatprep.mubr.msk.f32.mxu1 %vm270_vm1, %v265_v21 }
  0x1f   : > { %992 = vmatpush3.bf16.msra.mxu1 %v989_v41 }
  0x20   : > { %976 = vmatpush3.bf16.msra.mxu0 %v973_v42  ;;  %994 = vmatprep.subr.bf16.mxu1 %v993_v48 }
  0x21   : > { %978 = vmatprep.subr.bf16.mxu0 %v977_v49 }
  0x23   : > { %996 = vmatpush3.bf16.msra.mxu1 %v993_v48 }
  0x24   : > { %980 = vmatpush3.bf16.msra.mxu0 %v977_v49  ;;  %998 = vmatprep.subr.bf16.mxu1 %v997_v54 }
  0x25   : > { %982 = vmatprep.subr.bf16.mxu0 %v981_v55 }
  0x27   : > { %1000 = vmatpush3.bf16.msra.mxu1 %v997_v54 }
  0x28   : > { %984 = vmatpush3.bf16.msra.mxu0 %v981_v55 }
  0x2a   : > { %935 = vmatmul.mubr.msk.f32.vlgmr.msra.gmra.mrb[2].mxu1 %vm270_vm1, %v1115_v22 }
  0x2b   : > { %916 = vmatmul.mubr.msk.f32.vlgmr.msra.gmra.mrb[0].mxu0 %vm270_vm1, %v457_v56 }
  0xed   : > { %v879_v57 = vpop.f32.mrb[0].mxu1 }
  0xee   : > { %v366_v58 = vpop.f32.mrb[1].mxu1 }
  0xfd   : > { %v936_v60 = vpop.f32.mrb[2].mxu1 }
  0xfe   : > { %v917_v61 = vpop.f32.mrb[0].mxu0  ;;  %v672_v63 = vadd.f32 %v936_v60, %v815_v59  ;;  %v666_v0 = vpop.f32.mrb[3].mxu1 }
  0xff   : > { %v1001_v1 = vadd.f32 %v917_v61, %v879_v57  ;;  %v539_v2 = vpop.f32.mrb[1].mxu0  ;;  %v667_v3 = vadd.f32 %v815_v59, %v666_v0 }
 0x100   : > { %676 = vst [vmem:[%s1190_s30 + $0x8] sm:$0xff] %v672_v63  ;;  %v686_v4 = vmul.f32 %v672_v63, %v672_v63  ;;  %v1002_v5 = vadd.f32 %v539_v2, %v366_v58 }
 0x101   : > { %v558_v6 = vadd.f32 %v1001_v1, %v814_v62  ;;  %675 = vst [vmem:[%s1190_s30] sm:$0xff] %v667_v3  ;;  %v677_v7 = vadd.f32 %v672_v63, %v667_v3  ;;  %v685_v8 = vmul.f32 %v667_v3, %v667_v3 }
 0x102   : > { %v557_v9 = vadd.f32 %v1002_v5, %v814_v62 }
 0x103   : > { %560 = vst [vmem:[%s1198_s10 + $0x8] sm:$0xff] %v558_v6  ;;  %v570_v10 = vmul.f32 %v558_v6, %v558_v6  ;;  %v678_v11 = vrot.slane %v677_v7, 4  ;;  %v687_v12 = vadd.f32 %v686_v4, %v685_v8 }
 0x104   : > { %559 = vst [vmem:[%s1198_s10] sm:$0xff] %v557_v9  ;;  %v561_v13 = vadd.f32 %v558_v6, %v557_v9  ;;  %v569_v14 = vmul.f32 %v557_v9, %v557_v9 }
 0x105   : > { %v679_v15 = vadd.f32 %v678_v11, %v677_v7  ;;  %v688_v16 = vrot.slane %v687_v12, 4 }
 0x106   : > { %v562_v17 = vrot.slane %v561_v13, 4  ;;  %v571_v18 = vadd.f32 %v570_v10, %v569_v14 }
 0x107   : > { %v680_v19 = vrot.slane %v679_v15, 2  ;;  %v689_v20 = vadd.f32 %v688_v16, %v687_v12 }
 0x108   : > { %v563_v21 = vadd.f32 %v562_v17, %v561_v13  ;;  %v572_v22 = vrot.slane %v571_v18, 4 }
 0x109   : > { %v681_v23 = vadd.f32 %v680_v19, %v679_v15  ;;  %v690_v24 = vrot.slane %v689_v20, 2 }
 0x10a   : > { %v564_v25 = vrot.slane %v563_v21, 2  ;;  %v573_v26 = vadd.f32 %v572_v22, %v571_v18 }
 0x10b   : > { %v682_v27 = vrot.slane %v681_v23, 1  ;;  %v691_v28 = vadd.f32 %v690_v24, %v689_v20 }
 0x10c   : > { %v565_v29 = vadd.f32 %v564_v25, %v563_v21  ;;  %v574_v30 = vrot.slane %v573_v26, 2 }
 0x10d   : > { %v683_v31 = vadd.f32 %v682_v27, %v681_v23  ;;  %v692_v32 = vrot.slane %v691_v28, 1 }
 0x10e   : > { %v566_v33 = vrot.slane %v565_v29, 1  ;;  %v575_v34 = vadd.f32 %v574_v30, %v573_v26 }
 0x10f   : > { %684 = vst [vmem:[%s1190_s30 + $0x10] sm:$0x1] %v683_v31  ;;  %v693_v35 = vadd.f32 %v692_v32, %v691_v28 }
 0x110   : > { %v567_v36 = vadd.f32 %v566_v33, %v565_v29  ;;  %v576_v37 = vrot.slane %v575_v34, 1 }
 0x111   : > { %694 = vst [vmem:[%s1190_s30 + $0x11] sm:$0x1] %v693_v35 }
 0x112   : > { %568 = vst [vmem:[%s1198_s10 + $0x10] sm:$0x1] %v567_v36  ;;  %v577_v38 = vadd.f32 %v576_v37, %v575_v34 }
 0x114   : > { %578 = vst [vmem:[%s1198_s10 + $0x11] sm:$0x1] %v577_v38 }
 0x115 PF: > { %s17_s21 = sadd.s32 1, %s1021_s21  }
 0x116   : > { %p14_p4 = scmp.ge.s32.totalorder %s17_s21, 4  }
 0x118   :  { %16 = sbr.rel (!%p14_p4) target bundleno = 1 (0x1), region = 84 }

// kernel: block_forward.3
= control target key start
LH: loop header
LB: loop body
LE: loop exit
PB: predicated region body
PF: predicated region fallthrough
CT: control target
= control target key end

     0   :  { %s970_s18 = smov 0   ;;  %s1154_s0 = inlined_call_operand.vmem [shape: f32[2,18,128], index: 0, kind: input, shape index: {}]   ;;  %s1155_s1 = inlined_call_operand.vmem [shape: f32[1,128], index: 1, kind: input, shape index: {}]   ;;  %s1156_s2 = inlined_call_operand.vmem [shape: f32[1,128], index: 2, kind: input, shape index: {}]   ;;  %s1157_s3 = inlined_call_operand.vmem [shape: f32[3,128,128], index: 3, kind: input, shape index: {}]   ;;  %s1158_s4 = inlined_call_operand.vmem [shape: f32[1,128], index: 4, kind: input, shape index: {}]   ;;  %s1159_s5 = inlined_call_operand.vmem [shape: f32[2,18,128], index: 5, kind: output, shape index: {}]  }
   0x1 LB: > { %s618_s19 = sadd.s32 4294967295, %s937_s18   ;;  %p622_p0 = scmp.ge.s32.totalorder %s937_s18, 1  ;;  %s937_s18 = sphi %s970_s18, %s15_s18  }
   0x2   : > { %p187_p1 = scmp.lt.s32.totalorder %s937_s18, 3 }
   0x4   : > { %p188_p2 = pnand %p622_p0, %p187_p1 }
   0x5   : > { %v253_v0 = vld [vmem:[%s1157_s3] sm:$0xff] (!%p188_p2)  ;;  %v254_v1 = vld [vmem:[%s1157_s3 + $0x8] sm:$0xff] (!%p188_p2)  ;;  %v255_v2 = vld [vmem:[%s1157_s3 + $0x10] sm:$0xff] (!%p188_p2)  ;;  %p215_p3 = scmp.lt.s32.totalorder (!%p188_p2), %s618_s19, 1  ;;  %v939_v5 = vmov (!%p188_p2), 0.0  }
   0x6   : > { %191 = sbr.rel (%p188_p2) target bundleno = 306 (0x132), region = 40  ;;  %v853_v3 = vpack.c.bf16 (!%p188_p2), %v254_v1, %v253_v0  ;;  %v256_v4 = vld [vmem:[%s1157_s3 + $0x18] sm:$0xff] (!%p188_p2)  ;;  %247 = vst [vmem:[#allocation2] sm:$0x1] (!%p188_p2), %v939_v5  ;;  %248 = vst [vmem:[#allocation2 + $0x11] sm:$0x1] (!%p188_p2), %v939_v5 }
   0x7   : > { %v857_v6 = vpack.c.bf16 (!%p188_p2), %v256_v4, %v255_v2  ;;  %v257_v7 = vld [vmem:[%s1157_s3 + $0x20] sm:$0xff] (!%p188_p2)  ;;  %v258_v8 = vld [vmem:[%s1157_s3 + $0x28] sm:$0xff] (!%p188_p2)  ;;  %v259_v12 = vld [vmem:[%s1157_s3 + $0x30] sm:$0xff] (!%p188_p2) }
   0x8   : > { %854 = vmatprep.subr.bf16.mxu0 (!%p188_p2), %v853_v3  ;;  %v861_v9 = vpack.c.bf16 (!%p188_p2), %v258_v8, %v257_v7  ;;  %v627_v10 = vld [vmem:[%s1157_s3 + $0x80] sm:$0xff] (!%p188_p2)  ;;  %v628_v11 = vld [vmem:[%s1157_s3 + $0x88] sm:$0xff] (!%p188_p2)  ;;  %v260_v13 = vld [vmem:[%s1157_s3 + $0x38] sm:$0xff] (!%p188_p2) }
   0x9   : > { %856 = vmatpush3.bf16.msra.mxu0 (!%p188_p2), %v853_v3  ;;  %v821_v14 = vpack.c.bf16 (!%p188_p2), %v628_v11, %v627_v10  ;;  %v625_v15 = vld [vmem:[%s1155_s1] ss:$0 sm:$0xff] (!%p188_p2)  ;;  %v629_v21 = vld [vmem:[%s1157_s3 + $0x90] sm:$0xff] (!%p188_p2)  ;;  %v630_v22 = vld [vmem:[%s1157_s3 + $0x98] sm:$0xff] (!%p188_p2)  ;;  %v865_v23 = vpack.c.bf16 (!%p188_p2), %v260_v13, %v259_v12 }
   0xa   : > { %858 = vmatprep.subr.bf16.mxu0 (!%p188_p2), %v857_v6  ;;  %v626_v17 = vld [vmem:[%s1156_s2] ss:$0 sm:$0xff] (!%p188_p2)  ;;  %v825_v24 = vpack.c.bf16 (!%p188_p2), %v630_v22, %v629_v21  ;;  %v632_v26 = vld [vmem:[%s1157_s3 + $0xa8] sm:$0xff] (!%p188_p2)  ;;  %v633_v32 = vld [vmem:[%s1157_s3 + $0xb0] sm:$0xff] (!%p188_p2) }
   0xb   : > { %822 = vmatprep.subr.bf16.mxu1 (!%p188_p2), %v821_v14  ;;  %v631_v25 = vld [vmem:[%s1157_s3 + $0xa0] sm:$0xff] (!%p188_p2)  ;;  %v262_v28 = vld [vmem:[%s1157_s3 + $0x48] sm:$0xff] (!%p188_p2)  ;;  %v634_v33 = vld [vmem:[%s1157_s3 + $0xb8] sm:$0xff] (!%p188_p2) }
   0xc   : > { %824 = vmatpush3.bf16.msra.mxu1 (!%p188_p2), %v821_v14  ;;  %v261_v27 = vld [vmem:[%s1157_s3 + $0x40] sm:$0xff] (!%p188_p2)  ;;  %v829_v31 = vpack.c.bf16 (!%p188_p2), %v632_v26, %v631_v25  ;;  %v263_v37 = vld [vmem:[%s1157_s3 + $0x50] sm:$0xff] (!%p188_p2)  ;;  %v264_v38 = vld [vmem:[%s1157_s3 + $0x58] sm:$0xff] (!%p188_p2)  ;;  %v833_v39 = vpack.c.bf16 (!%p188_p2), %v634_v33, %v633_v32 }
   0xd   : > { %s1161_s19 = smov (!%p215_p3, %s618_s19), 1  ;;  %860 = vmatpush3.bf16.msra.mxu0 %v857_v6  ;;  %826 = vmatprep.subr.bf16.mxu1 %v825_v24  ;;  %v869_v36 = vpack.c.bf16 %v262_v28, %v261_v27  ;;  %v635_v40 = vld [vmem:[%s1157_s3 + $0xc0] sm:$0xff]  ;;  %v636_v41 = vld [vmem:[%s1157_s3 + $0xc8] sm:$0xff]  ;;  %v873_v42 = vpack.c.bf16 %v264_v38, %v263_v37  ;;  %v637_v46 = vld [vmem:[%s1157_s3 + $0xd0] sm:$0xff] }
   0xe   : > { %s921_s7 = smul.u32 24, %s1161_s19  ;;  %862 = vmatprep.subr.bf16.mxu0 %v861_v9  ;;  %v265_v43 = vld [vmem:[%s1157_s3 + $0x60] sm:$0xff]  ;;  %v266_v44 = vld [vmem:[%s1157_s3 + $0x68] sm:$0xff]  ;;  %v837_v45 = vpack.c.bf16 %v636_v41, %v635_v40  ;;  %v638_v47 = vld [vmem:[%s1157_s3 + $0xd8] sm:$0xff] }
   0xf   : > { %v877_v48 = vpack.c.bf16 %v266_v44, %v265_v43  ;;  %v267_v50 = vld [vmem:[%s1157_s3 + $0x70] sm:$0xff]  ;;  %v268_v51 = vld [vmem:[%s1157_s3 + $0x78] sm:$0xff]  ;;  %v841_v52 = vpack.c.bf16 %v638_v47, %v637_v46  ;;  %v639_v53 = vld [vmem:[%s1157_s3 + $0xe0] sm:$0xff] }
  0x10   : > { %s219_s20 = scalar_lea.vmem %s1154_s0, %s921_s7  ;;  %828 = vmatpush3.bf16.msra.mxu1 %v825_v24  ;;  %v640_v54 = vld [vmem:[%s1157_s3 + $0xe8] sm:$0xff]  ;;  %v881_v55 = vpack.c.bf16 %v268_v51, %v267_v50  ;;  %v643_v56 = vld [vmem:[%s1157_s3 + $0x100] sm:$0xff]  ;;  %v641_v59 = vld [vmem:[%s1157_s3 + $0xf0] sm:$0xff]  ;;  %s224_s15 = scalar_lea.vmem %s1159_s5, %s921_s7 }
  0x11   : > { %v225_v16 = vld [vmem:[%s219_s20] sm:$0xff]  ;;  %v226_v18 = vld [vmem:[%s219_s20 + $0x8] sm:$0xff]  ;;  %864 = vmatpush3.bf16.msra.mxu0 %v861_v9  ;;  %830 = vmatprep.subr.bf16.mxu1 %v829_v31  ;;  %v845_v58 = vpack.c.bf16 %v640_v54, %v639_v53  ;;  %v642_v60 = vld [vmem:[%s1157_s3 + $0xf8] sm:$0xff] }
  0x12   : > { %v234_v19 = vmul.f32 %v625_v15, %v225_v16  ;;  %v235_v20 = vmul.f32 %v625_v15, %v226_v18  ;;  %866 = vmatprep.subr.bf16.mxu0 %v865_v23  ;;  %v644_v57 = vld [vmem:[%s1157_s3 + $0x108] sm:$0xff]  ;;  %v645_v62 = vld [vmem:[%s1157_s3 + $0x110] sm:$0xff]  ;;  %v646_v63 = vld [vmem:[%s1157_s3 + $0x118] sm:$0xff]  ;;  %v849_v0 = vpack.c.bf16 %v642_v60, %v641_v59 }
  0x13   : > { %v885_v61 = vpack.c.bf16 %v644_v57, %v643_v56  ;;  %v889_v2 = vpack.c.bf16 %v646_v63, %v645_v62  ;;  %v647_v4 = vld [vmem:[%s1157_s3 + $0x120] sm:$0xff]  ;;  %v648_v5 = vld [vmem:[%s1157_s3 + $0x128] sm:$0xff]  ;;  %v649_v7 = vld [vmem:[%s1157_s3 + $0x130] sm:$0xff] }
  0x14   : > { %v243_v29 = vadd.f32 %v626_v17, %v234_v19  ;;  %v1040_v30 = vadd.f32 %v626_v17, %v235_v20  ;;  %832 = vmatpush3.bf16.msra.mxu1 %v829_v31  ;;  %v893_v6 = vpack.c.bf16 %v648_v5, %v647_v4  ;;  %v650_v8 = vld [vmem:[%s1157_s3 + $0x138] sm:$0xff]  ;;  %v651_v10 = vld [vmem:[%s1157_s3 + $0x140] sm:$0xff]  ;;  %v652_v11 = vld [vmem:[%s1157_s3 + $0x148] sm:$0xff] }
  0x15   : > { %868 = vmatpush3.bf16.msra.mxu0 %v865_v23  ;;  %834 = vmatprep.subr.bf16.mxu1 %v833_v39  ;;  %v897_v9 = vpack.c.bf16 %v650_v8, %v649_v7  ;;  %v901_v12 = vpack.c.bf16 %v652_v11, %v651_v10  ;;  %v653_v13 = vld [vmem:[%s1157_s3 + $0x150] sm:$0xff]  ;;  %v654_v14 = vld [vmem:[%s1157_s3 + $0x158] sm:$0xff]  ;;  %v655_v16 = vld [vmem:[%s1157_s3 + $0x160] sm:$0xff] }
  0x16   : > { %v245_v34 = vmax.f32 %v243_v29, 0.0  ;;  %v246_v35 = vmax.f32 %v1040_v30, 0.0  ;;  %870 = vmatprep.subr.bf16.mxu0 %v869_v36  ;;  %v905_v15 = vpack.c.bf16 %v654_v14, %v653_v13  ;;  %v656_v17 = vld [vmem:[%s1157_s3 + $0x168] sm:$0xff]  ;;  %v657_v19 = vld [vmem:[%s1157_s3 + $0x170] sm:$0xff]  ;;  %v658_v20 = vld [vmem:[%s1157_s3 + $0x178] sm:$0xff] }
  0x17   : > { %v909_v18 = vpack.c.bf16 %v656_v17, %v655_v16  ;;  %v913_v21 = vpack.c.bf16 %v658_v20, %v657_v19  ;;  %v659_v26 = vld [vmem:[%s1158_s4] ss:$0 sm:$0xff] }
  0x18   : > { %249 = vst [vmem:[#allocation2 + $0x1] sm:$0xff] %v245_v34  ;;  %250 = vst [vmem:[#allocation2 + $0x9] sm:$0xff] %v246_v35  ;;  %748 = vmatprep.mubr.f32.mxu1 %v245_v34  ;;  %836 = vmatpush3.bf16.msra.mxu1 %v833_v39 }
  0x19   : > { %872 = vmatpush3.bf16.msra.mxu0 %v869_v36  ;;  %838 = vmatprep.subr.bf16.mxu1 %v837_v45 }
  0x1a   : > { %874 = vmatprep.subr.bf16.mxu0 %v873_v42 }
  0x1c   : > { %840 = vmatpush3.bf16.msra.mxu1 %v837_v45 }
  0x1d   : > { %876 = vmatpush3.bf16.msra.mxu0 %v873_v42  ;;  %842 = vmatprep.subr.bf16.mxu1 %v841_v52 }
  0x1e   : > { %878 = vmatprep.subr.bf16.mxu0 %v877_v48 }
  0x1f   : > { %v251_v49 = vld [vmem:[#allocation2] sm:$0xff]  ;;  %v252_v1 = vld [vmem:[#allocation2 + $0x8] sm:$0xff] }
  0x20   : > { %783 = vmatprep.mubr.f32.mxu0 %v251_v49  ;;  %844 = vmatpush3.bf16.msra.mxu1 %v841_v52  ;;  %v438_v3 = vld [vmem:[#allocation2 + $0x2] sm:$0xff]  ;;  %v439_v22 = vld [vmem:[#allocation2 + $0xa] sm:$0xff] }
  0x21   : > { %880 = vmatpush3.bf16.msra.mxu0 %v877_v48  ;;  %846 = vmatprep.subr.bf16.mxu1 %v845_v58 }
  0x22   : > { %882 = vmatprep.subr.bf16.mxu0 %v881_v55 }
  0x24   : > { %848 = vmatpush3.bf16.msra.mxu1 %v845_v58 }
  0x25   : > { %884 = vmatpush3.bf16.msra.mxu0 %v881_v55  ;;  %850 = vmatprep.subr.bf16.mxu1 %v849_v0 }
  0x26   : > { %886 = vmatprep.subr.bf16.mxu0 %v885_v61 }
  0x28   : > { %784 = vmatmul.mubr.f32.vlgmr.msra.gmra.mrb[0].mxu0 %v252_v1  ;;  %852 = vmatpush3.bf16.msra.mxu1 %v849_v0 }
  0x29   : > { %888 = vmatpush3.bf16.msra.mxu0 %v885_v61  ;;  %818 = vmatprep.mubr.f32.mxu0 %v438_v3 }
  0x2a   : > { %890 = vmatprep.subr.bf16.mxu0 %v889_v2 }
  0x2b   : > { %749 = vmatmul.mubr.f32.vlgmr.msra.gmra.mrb[0].mxu1 %v246_v35 }
  0x2d   : > { %892 = vmatpush3.bf16.msra.mxu0 %v889_v2 }
  0x2e   : > { %894 = vmatprep.subr.bf16.mxu0 %v893_v6 }
  0x31   : > { %896 = vmatpush3.bf16.msra.mxu0 %v893_v6 }
  0x32   : > { %898 = vmatprep.subr.bf16.mxu0 %v897_v9 }
  0x35   : > { %900 = vmatpush3.bf16.msra.mxu0 %v897_v9 }
  0x36   : > { %902 = vmatprep.subr.bf16.mxu0 %v901_v12 }
  0x39   : > { %904 = vmatpush3.bf16.msra.mxu0 %v901_v12 }
  0x3a   : > { %906 = vmatprep.subr.bf16.mxu0 %v905_v15 }
  0x3d   : > { %908 = vmatpush3.bf16.msra.mxu0 %v905_v15 }
  0x3e   : > { %910 = vmatprep.subr.bf16.mxu0 %v909_v18 }
  0x41   : > { %912 = vmatpush3.bf16.msra.mxu0 %v909_v18 }
  0x42   : > { %914 = vmatprep.subr.bf16.mxu0 %v913_v21 }
  0x45   : > { %916 = vmatpush3.bf16.msra.mxu0 %v913_v21 }
  0x48   : > { %819 = vmatmul.mubr.f32.vlgmr.msra.gmra.mrb[0].mxu0 %v439_v22 }
  0xfe   : > { %v750_v23 = vpop.f32.mrb[0].mxu1 }
  0xff   : > { %v354_v24 = vpop.f32.mrb[1].mxu1 }
 0x11b   : > { %v820_v25 = vpop.f32.mrb[0].mxu0 }
 0x11c   : > { %v917_v27 = vadd.f32 %v820_v25, %v750_v23  ;;  %v523_v28 = vpop.f32.mrb[1].mxu0 }
 0x11d   : > { %v918_v29 = vadd.f32 %v523_v28, %v354_v24 }
 0x11e   : > { %v542_v30 = vadd.f32 %v917_v27, %v659_v26 }
 0x11f   : > { %v541_v31 = vadd.f32 %v918_v29, %v659_v26 }
 0x120   : > { %544 = vst [vmem:[%s224_s15 + $0x8] sm:$0xff] %v542_v30  ;;  %v554_v32 = vmul.f32 %v542_v30, %v542_v30 }
 0x121   : > { %543 = vst [vmem:[%s224_s15] sm:$0xff] %v541_v31  ;;  %v545_v33 = vadd.f32 %v542_v30, %v541_v31  ;;  %v553_v34 = vmul.f32 %v541_v31, %v541_v31 }
 0x123   : > { %v546_v35 = vrot.slane %v545_v33, 4  ;;  %v555_v36 = vadd.f32 %v554_v32, %v553_v34 }
 0x125   : > { %v547_v37 = vadd.f32 %v546_v35, %v545_v33  ;;  %v556_v38 = vrot.slane %v555_v36, 4 }
 0x127   : > { %v548_v39 = vrot.slane %v547_v37, 2  ;;  %v557_v40 = vadd.f32 %v556_v38, %v555_v36 }
 0x129   : > { %v549_v41 = vadd.f32 %v548_v39, %v547_v37  ;;  %v558_v42 = vrot.slane %v557_v40, 2 }
 0x12b   : > { %v550_v43 = vrot.slane %v549_v41, 1  ;;  %v559_v44 = vadd.f32 %v558_v42, %v557_v40 }
 0x12d   : > { %v551_v45 = vadd.f32 %v550_v43, %v549_v41  ;;  %v560_v46 = vrot.slane %v559_v44, 1 }
 0x12f   : > { %552 = vst [vmem:[%s224_s15 + $0x10] sm:$0x1] %v551_v45  ;;  %v561_v47 = vadd.f32 %v560_v46, %v559_v44 }
 0x131   : > { %562 = vst [vmem:[%s224_s15 + $0x11] sm:$0x1] %v561_v47 }
 0x132 PF: > { %s15_s18 = sadd.s32 1, %s937_s18  }
 0x133   : > { %p12_p4 = scmp.ge.s32.totalorder %s15_s18, 4  }
 0x135   :  { %14 = sbr.rel (!%p12_p4) target bundleno = 1 (0x1), region = 72 }

</bundles_post_ra>
